<compile_context>
chip_gen: v7x
topology: tpu7x:2x2x1
jax: 0.10.0
libtpu: 0.0.40
codegen_flags: <defaults>
</compile_context>

<pallas_src>
import jax
import jax.numpy as jnp
from jax.experimental import pallas as pl
from jax.experimental.pallas import tpu as pltpu


def _round_up(n, m):
    n, m = int(n), int(m)
    return ((n + m - 1) // m) * m


def _vmem_capacity_bytes():
    try:
        return int(pltpu.get_tpu_info().vmem_capacity_bytes)
    except Exception:
        return 64 * 1024 * 1024  # conservative (v7x) fallback


def _mish_chunk(x_ref, w1_ref, b1_ref, w2_ref, use_newton):
    """f32 contribution of one hidden chunk:  mish(x @ w1 + b1) @ w2."""
    # Upscale: native-dtype operands, f32 accumulation on the MXU.
    h = jnp.dot(x_ref[...], w1_ref[...], preferred_element_type=jnp.float32)
    h = h + b1_ref[...].astype(jnp.float32)

    # Mish in f32 with a single exp:
    #   tanh(softplus(h)) = n / (n + 2),  n = e * (e + 2),  e = exp(h)
    # One EUP exp + one EUP approx-vrcp; Newton step (VPU) only when the
    # downstream matmul runs in f32 (bf16 operands can't see the vrcp error).
    e = jnp.exp(jnp.minimum(h, 20.0))
    n = e * (e + 2.0)
    d = n + 2.0
    r = pl.reciprocal(d, approx=True)
    if use_newton:
        r = r * (2.0 - d * r)
    mish = jnp.where(h > 20.0, h, h * n * r)  # matches torch softplus threshold=20

    # Downscale: this hidden chunk's contribution, f32 accumulated.
    return jnp.dot(mish.astype(w2_ref.dtype), w2_ref[...],
                   preferred_element_type=jnp.float32)


def _make_kernel_f32out(use_newton):
    """Output dtype is f32 -> accumulate directly into o_ref (resident across k)."""
    def kernel(x_ref, w1_ref, b1_ref, w2_ref, b2_ref, o_ref):
        k = pl.program_id(1)
        contrib = _mish_chunk(x_ref, w1_ref, b1_ref, w2_ref, use_newton)

        @pl.when(k == 0)
        def _init():
            # Dropout: module evaluated in inference mode -> identity.
            # TODO(synk): training-mode dropout (PRNG mask) is not implemented.
            o_ref[...] = contrib + b2_ref[...].astype(jnp.float32)

        @pl.when(k > 0)
        def _accum():
            o_ref[...] += contrib

    return kernel


def _make_kernel_acc(use_newton):
    """Non-f32 output -> accumulate in an f32 VMEM scratch, cast on finalize."""
    def kernel(x_ref, w1_ref, b1_ref, w2_ref, b2_ref, o_ref, acc_ref):
        k = pl.program_id(1)

        @pl.when(k == 0)
        def _init():
            acc_ref[...] = jnp.zeros_like(acc_ref)

        acc_ref[...] += _mish_chunk(x_ref, w1_ref, b1_ref, w2_ref, use_newton)

        @pl.when(k == pl.num_programs(1) - 1)
        def _finalize():
            o_ref[...] = (acc_ref[...] + b2_ref[...].astype(jnp.float32)).astype(o_ref.dtype)

    return kernel


def feedforward_net(x, w1, b1, w2, b2, *, compute_dtype=jnp.bfloat16,
                    tile_rows=512, tile_hidden=512):
    """y = mish(x @ w1 + b1) @ w2 + b2 applied over the last axis of x.

    x : (..., D_in); w1 : (D_in, H); b1 : (H,); w2 : (H, D_in); b2 : (D_in,).
    Weights are the transposes of the PyTorch nn.Linear .weight tensors.
    `compute_dtype` is the MXU operand dtype (bf16 by default; f32 for bit-accuracy).
    """
    orig_shape = x.shape
    d_in = orig_shape[-1]
    hidden = w1.shape[1]
    assert w1.shape == (d_in, hidden) and b1.shape == (hidden,)
    assert w2.shape == (hidden, d_in) and b2.shape == (d_in,)

    xr = x.reshape(-1, d_in)
    rows = xr.shape[0]

    # ---- row tile: MXU-aligned; >= 2 row tiles for large batches (v7x dual-TC) ----
    if rows >= 128:
        tr = max(128, _round_up(min(tile_rows, rows), 128))
        if rows >= 256:
            tr = min(tr, _round_up((rows + 1) // 2, 128))
        tile_rows = tr
    else:
        tile_rows = max(8, _round_up(rows, 8))
    rows_pad = _round_up(rows, tile_rows)

    # ---- feature / hidden padding (lane dim -> multiples of 128) ----
    d_pad = _round_up(d_in, 128)
    h_full = _round_up(hidden, 128)

    w_sz = jnp.dtype(compute_dtype).itemsize
    out_sz = jnp.dtype(x.dtype).itemsize
    out_is_f32 = jnp.dtype(x.dtype) == jnp.dtype(jnp.float32)
    use_newton = jnp.dtype(compute_dtype) == jnp.dtype(jnp.float32)

    def vmem_est(tr, th):
        acc_bytes = 0 if out_is_f32 else tr * d_pad * 4
        return (2 * tr * d_pad * w_sz        # x row tiles (double-buffered, compute dtype)
                + 2 * tr * d_pad * out_sz    # output row tiles
                + 2 * d_pad * th * w_sz      # w1 chunk(s)
                + 2 * th * d_pad * w_sz      # w2 chunk(s)
                + 2 * (th + d_pad) * 4       # bias tiles (f32)
                + acc_bytes)                 # f32 accumulator scratch (bf16 outputs only)

    cap = _vmem_capacity_bytes()
    budget = cap - (16 << 20) if cap <= (64 << 20) else cap - (28 << 20)
    budget = max(budget, 16 << 20)

    # ---- hidden tile: prefer full weight residency; otherwise stream >=256 chunks ----
    if vmem_est(tile_rows, h_full) <= budget:
        tile_hidden = h_full                       # weights DMA'd once, k-grid collapses to 1
    else:
        tile_hidden = min(max(256, _round_up(tile_hidden, 128)), h_full)
        while tile_hidden > 256 and vmem_est(tile_rows, tile_hidden) > budget:
            tile_hidden = max(256, _round_up(tile_hidden // 2, 128))
        while tile_rows > 128 and vmem_est(tile_rows, tile_hidden) > budget:
            tile_rows = max(128, _round_up(tile_rows // 2, 128))
            rows_pad = _round_up(rows, tile_rows)
    h_pad = _round_up(hidden, tile_hidden)

    # ---- pad + cast operands (zero padding is mathematically exact after the final slice) ----
    def pad2(a, r, c):
        pr, pc = r - a.shape[0], c - a.shape[1]
        return jnp.pad(a, ((0, pr), (0, pc))) if (pr or pc) else a

    xr_p = pad2(xr, rows_pad, d_pad).astype(compute_dtype)
    w1_p = pad2(w1, d_pad, h_pad).astype(compute_dtype)
    w2_p = pad2(w2, h_pad, d_pad).astype(compute_dtype)
    b1_p = pad2(b1.reshape(1, hidden).astype(jnp.float32), 1, h_pad)
    b2_p = pad2(b2.reshape(1, d_in).astype(jnp.float32), 1, d_pad)

    grid = (rows_pad // tile_rows, h_pad // tile_hidden)   # reduction (hidden) axis last

    if out_is_f32:
        kernel = _make_kernel_f32out(use_newton)
        scratch = []
    else:
        kernel = _make_kernel_acc(use_newton)
        scratch = [pltpu.VMEM((tile_rows, d_pad), jnp.float32)]

    est = vmem_est(tile_rows, tile_hidden)
    vmem_limit = int(min(budget, max(int(1.5 * est), 16 << 20)))

    out = pl.pallas_call(
        kernel,
        out_shape=jax.ShapeDtypeStruct((rows_pad, d_pad), x.dtype),
        grid_spec=pltpu.PrefetchScalarGridSpec(
            num_scalar_prefetch=0,
            grid=grid,
            in_specs=[
                pl.BlockSpec((tile_rows, d_pad), lambda i, k: (i, 0)),    # x row tile
                pl.BlockSpec((d_pad, tile_hidden), lambda i, k: (0, k)),  # w1 hidden chunk
                pl.BlockSpec((1, tile_hidden), lambda i, k: (0, k)),      # b1 hidden chunk
                pl.BlockSpec((tile_hidden, d_pad), lambda i, k: (k, 0)),  # w2 hidden chunk
                pl.BlockSpec((1, d_pad), lambda i, k: (0, 0)),            # b2 (full)
            ],
            out_specs=pl.BlockSpec((tile_rows, d_pad), lambda i, k: (i, 0)),
            scratch_shapes=scratch,
        ),
        compiler_params=pltpu.CompilerParams(
            dimension_semantics=("parallel", "arbitrary"),
            vmem_limit_bytes=vmem_limit,
        ),
    )(xr_p, w1_p, b1_p, w2_p, b2_p)

    return out[:rows, :d_in].reshape(orig_shape)


def init_params(key, inputs, hidden, dtype=jnp.float32):
    """Deterministic params (shapes match nn.Linear(inputs, hidden) / (hidden, inputs), transposed)."""
    k1, k2, k3, k4 = jax.random.split(key, 4)
    s1 = 1.0 / float(inputs) ** 0.5
    s2 = 1.0 / float(hidden) ** 0.5
    w1 = jax.random.uniform(k1, (inputs, hidden), dtype, minval=-s1, maxval=s1)  # upscale.weight.T
    b1 = jax.random.uniform(k2, (hidden,), dtype, minval=-s1, maxval=s1)         # upscale.bias
    w2 = jax.random.uniform(k3, (hidden, inputs), dtype, minval=-s2, maxval=s2)  # downscale.weight.T
    b2 = jax.random.uniform(k4, (inputs,), dtype, minval=-s2, maxval=s2)         # downscale.bias
    return w1, b1, w2, b2


def _reference(x, w1, b1, w2, b2):
    h = x @ w1 + b1
    h = h * jnp.tanh(jax.nn.softplus(h))
    return h @ w2 + b2


if __name__ == "__main__":
    batch, seq, inputs, hidden = 2, 16, 16, 32
    key = jax.random.PRNGKey(0)
    kx, kp = jax.random.split(key)
    x = jax.random.normal(kx, (batch, seq, inputs), jnp.float32)
    w1, b1, w2, b2 = init_params(kp, inputs, hidden)

    y_ref = _reference(x, w1, b1, w2, b2)

    # f32 compute path: tight tolerance vs. the f32 reference.
    y32 = jax.block_until_ready(
        feedforward_net(x, w1, b1, w2, b2, compute_dtype=jnp.float32))
    assert y32.shape == x.shape
    err32 = float(jnp.max(jnp.abs(y32 - y_ref)))
    assert jnp.allclose(y32, y_ref, atol=1e-4, rtol=1e-4), \
        f"f32 path mismatch vs reference (max abs err {err32})"

    # Default bf16 MXU path: tolerance reflects bf16 operand precision (f32 accumulation).
    ybf = jax.block_until_ready(feedforward_net(x, w1, b1, w2, b2))
    assert ybf.shape == x.shape
    errbf = float(jnp.max(jnp.abs(ybf - y_ref)))
    assert jnp.allclose(ybf, y_ref, atol=5e-2, rtol=5e-2), \
        f"bf16 path mismatch vs reference (max abs err {errbf})"

    print("KERNEL_OK")
</pallas_src>

<mosaic_0001>
module attributes {stable_mosaic.version = 11 : i64} {
  func.func @kernel(%arg0: i32, %arg1: i32, %arg2: memref<32x128xf32, #tpu.memory_space<vmem>>, %arg3: memref<128x128xf32, #tpu.memory_space<vmem>>, %arg4: memref<1x128xf32, #tpu.memory_space<vmem>>, %arg5: memref<128x128xf32, #tpu.memory_space<vmem>>, %arg6: memref<1x128xf32, #tpu.memory_space<vmem>>, %arg7: memref<32x128xf32, #tpu.memory_space<vmem>>) attributes {dimension_semantics = [#tpu.dimension_semantics<parallel>, #tpu.dimension_semantics<arbitrary>], iteration_bounds = array<i64: 1, 1>, scalar_prefetch = 0 : i64, scratch_operands = 0 : i64, tpu.core_type = #tpu.core_type<tc>, window_params = [{transform_indices = @transform_0, window_bounds = array<i64: 32, 128>}, {transform_indices = @transform_1, window_bounds = array<i64: 128, 128>}, {transform_indices = @transform_2, window_bounds = array<i64: 1, 128>}, {transform_indices = @transform_3, window_bounds = array<i64: 128, 128>}, {pipeline_mode = #tpu.pipeline_mode<synchronous>, transform_indices = @transform_4, window_bounds = array<i64: 1, 128>}, {transform_indices = @transform_5, window_bounds = array<i64: 32, 128>}]} {
    %c0 = arith.constant 0 : index
    %c0_0 = arith.constant 0 : index
    %0 = vector.load %arg2[%c0, %c0_0] : memref<32x128xf32, #tpu.memory_space<vmem>>, vector<32x128xf32>
    %c0_1 = arith.constant 0 : index
    %c0_2 = arith.constant 0 : index
    %1 = vector.load %arg3[%c0_1, %c0_2] : memref<128x128xf32, #tpu.memory_space<vmem>>, vector<128x128xf32>
    %cst = arith.constant dense<0.000000e+00> : vector<32x128xf32>
    %2 = tpu.matmul %0, %1, %cst {dimension_numbers = #tpu.dot_dimension_numbers<[1], [0], [0], [1], [0, 0, 1, 1], [], []>} : vector<32x128xf32>, vector<128x128xf32>, vector<32x128xf32> -> vector<32x128xf32>
    %c0_3 = arith.constant 0 : index
    %c0_4 = arith.constant 0 : index
    %3 = vector.load %arg4[%c0_3, %c0_4] : memref<1x128xf32, #tpu.memory_space<vmem>>, vector<1x128xf32>
    %4 = vector.broadcast %3 : vector<1x128xf32> to vector<32x128xf32>
    %5 = arith.addf %2, %4 : vector<32x128xf32>
    %cst_5 = arith.constant 2.000000e+01 : f32
    %6 = vector.broadcast %cst_5 : f32 to vector<32x128xf32>
    %7 = arith.minimumf %5, %6 : vector<32x128xf32>
    %8 = math.exp %7 : vector<32x128xf32>
    %cst_6 = arith.constant 2.000000e+00 : f32
    %9 = vector.broadcast %cst_6 : f32 to vector<32x128xf32>
    %10 = arith.addf %8, %9 : vector<32x128xf32>
    %11 = arith.mulf %8, %10 : vector<32x128xf32>
    %cst_7 = arith.constant 2.000000e+00 : f32
    %12 = vector.broadcast %cst_7 : f32 to vector<32x128xf32>
    %13 = arith.addf %11, %12 : vector<32x128xf32>
    %14 = tpu.reciprocal %13 {approx = true} : vector<32x128xf32> -> vector<32x128xf32>
    %15 = arith.mulf %13, %14 : vector<32x128xf32>
    %cst_8 = arith.constant 2.000000e+00 : f32
    %16 = vector.broadcast %cst_8 : f32 to vector<32x128xf32>
    %17 = arith.subf %16, %15 : vector<32x128xf32>
    %18 = arith.mulf %14, %17 : vector<32x128xf32>
    %cst_9 = arith.constant 2.000000e+01 : f32
    %19 = vector.broadcast %cst_9 : f32 to vector<32x128xf32>
    %20 = arith.cmpf ogt, %5, %19 : vector<32x128xf32>
    %21 = arith.mulf %5, %11 : vector<32x128xf32>
    %22 = arith.mulf %21, %18 : vector<32x128xf32>
    %23 = arith.select %20, %5, %22 : vector<32x128xi1>, vector<32x128xf32>
    %c0_10 = arith.constant 0 : index
    %c0_11 = arith.constant 0 : index
    %24 = vector.load %arg5[%c0_10, %c0_11] : memref<128x128xf32, #tpu.memory_space<vmem>>, vector<128x128xf32>
    %cst_12 = arith.constant dense<0.000000e+00> : vector<32x128xf32>
    %25 = tpu.matmul %23, %24, %cst_12 {dimension_numbers = #tpu.dot_dimension_numbers<[1], [0], [0], [1], [0, 0, 1, 1], [], []>} : vector<32x128xf32>, vector<128x128xf32>, vector<32x128xf32> -> vector<32x128xf32>
    %c0_i32 = arith.constant 0 : i32
    %26 = arith.cmpi eq, %arg1, %c0_i32 : i32
    %27 = arith.extui %26 : i1 to i32
    %c0_i32_13 = arith.constant 0 : i32
    %28 = arith.cmpi ne, %27, %c0_i32_13 : i32
    scf.if %28 {
      %c0_16 = arith.constant 0 : index
      %c0_17 = arith.constant 0 : index
      %32 = vector.load %arg6[%c0_16, %c0_17] : memref<1x128xf32, #tpu.memory_space<vmem>>, vector<1x128xf32>
      %33 = vector.broadcast %32 : vector<1x128xf32> to vector<32x128xf32>
      %34 = arith.addf %25, %33 : vector<32x128xf32>
      %c0_18 = arith.constant 0 : index
      %c0_19 = arith.constant 0 : index
      %35 = vector.load %arg7[%c0_18, %c0_19] : memref<32x128xf32, #tpu.memory_space<vmem>>, vector<32x128xf32>
      tpu.vector_store %arg7[%c0_18, %c0_19], %34 {strides = array<i32>} : memref<32x128xf32, #tpu.memory_space<vmem>>, vector<32x128xf32>,
    } else {
    }
    %c0_i32_14 = arith.constant 0 : i32
    %29 = arith.cmpi sgt, %arg1, %c0_i32_14 : i32
    %30 = arith.extui %29 : i1 to i32
    %c0_i32_15 = arith.constant 0 : i32
    %31 = arith.cmpi ne, %30, %c0_i32_15 : i32
    scf.if %31 {
      %c0_16 = arith.constant 0 : index
      %c0_17 = arith.constant 0 : index
      %32 = vector.load %arg7[%c0_16, %c0_17] : memref<32x128xf32, #tpu.memory_space<vmem>>, vector<32x128xf32>
      %33 = arith.addf %32, %25 : vector<32x128xf32>
      %c0_18 = arith.constant 0 : index
      %c0_19 = arith.constant 0 : index
      %34 = vector.load %arg7[%c0_18, %c0_19] : memref<32x128xf32, #tpu.memory_space<vmem>>, vector<32x128xf32>
      tpu.vector_store %arg7[%c0_18, %c0_19], %33 {strides = array<i32>} : memref<32x128xf32, #tpu.memory_space<vmem>>, vector<32x128xf32>,
    } else {
    }
    return
  }
  func.func @transform_0(%arg0: i32, %arg1: i32) -> (i32, i32) {
    %c0_i32 = arith.constant 0 : i32
    %c0_i32_0 = arith.constant 0 : i32
    return %arg0, %c0_i32 : i32, i32
  }
  func.func @transform_1(%arg0: i32, %arg1: i32) -> (i32, i32) {
    %c0_i32 = arith.constant 0 : i32
    %c0_i32_0 = arith.constant 0 : i32
    return %c0_i32, %arg1 : i32, i32
  }
  func.func @transform_2(%arg0: i32, %arg1: i32) -> (i32, i32) {
    %c0_i32 = arith.constant 0 : i32
    %c0_i32_0 = arith.constant 0 : i32
    return %c0_i32, %arg1 : i32, i32
  }
  func.func @transform_3(%arg0: i32, %arg1: i32) -> (i32, i32) {
    %c0_i32 = arith.constant 0 : i32
    %c0_i32_0 = arith.constant 0 : i32
    return %arg1, %c0_i32 : i32, i32
  }
  func.func @transform_4(%arg0: i32, %arg1: i32) -> (i32, i32) {
    %c0_i32 = arith.constant 0 : i32
    %c0_i32_0 = arith.constant 0 : i32
    %c0_i32_1 = arith.constant 0 : i32
    return %c0_i32, %c0_i32_0 : i32, i32
  }
  func.func @transform_5(%arg0: i32, %arg1: i32) -> (i32, i32) {
    %c0_i32 = arith.constant 0 : i32
    %c0_i32_0 = arith.constant 0 : i32
    return %arg0, %c0_i32 : i32, i32
  }
}

</mosaic_0001>

<bundles_post_ra>
// kernel: tpu_custom_call.1
= control target key start
LH: loop header
LB: loop body
LE: loop exit
PB: predicated region body
PF: predicated region fallthrough
CT: control target
= control target key end

     0   :  { %10 = vsyncpa [#allocation3], 0  ;;  %s803_s0 = inlined_call_operand.hbm [shape: f32[32,128], index: 0, kind: input, shape index: {}]   ;;  %s804_s1 = inlined_call_operand.hbm [shape: f32[128,128], index: 1, kind: input, shape index: {}]   ;;  %s805_s2 = inlined_call_operand.vmem [shape: f32[1,128], index: 2, kind: input, shape index: {}]   ;;  %s806_s3 = inlined_call_operand.hbm [shape: f32[128,128], index: 3, kind: input, shape index: {}]   ;;  %s807_s4 = inlined_call_operand.vmem [shape: f32[1,128], index: 4, kind: input, shape index: {}]   ;;  %s808_s5 = inlined_call_operand.hbm [shape: f32[32,128], index: 5, kind: output, shape index: {}]  }
   0x1   :  { %11 = vsyncpa [#allocation6], 0 }
   0x2   :  { %12 = vsyncpa [#allocation4], 0  ;;  %s682_s18 = smov [#allocation5]   ;;  %s683_s20 = smov [#allocation2]  }
   0x3   :  { %s30_s19 = sshll.u32 %s682_s18, 4  ;;  %s18_s21 = sshll.u32 %s683_s20, 4  ;;  %s31_s19 = int_to_ptr.vmem [resolvable:$true] %s30_s19  ;;  %s718_s21 = int_to_ptr.vmem [resolvable:$true] %s18_s21 }
   0x4   :  { %s588_s24 = scalar_lea.hbm %s804_s1, 2048 }
   0x5   :  { %p589_p0 = scmp.ne.s32.totalorder %s804_s1, %s588_s24  ;;  %p592_p1 = scmp.lt.u32.totalorder %s588_s24, %s804_s1 }
   0x7   :  { %p594_p2 = pnand %p592_p1, %p589_p0 }
   0x9   :  { %597 = shalt.err (!%p594_p2)
}
   0xa   :  { %s598_s29 = scalar_lea.vmem %s31_s19, 2048  ;;  %p603_p4 = scmp.lt.s32.totalorder %s31_s19, %s31_s19 }
   0xb   :  { %p599_p3 = scmp.ne.s32.totalorder %s31_s19, %s598_s29  ;;  %p604_p5 = scmp.lt.s32.totalorder %s598_s29, %s598_s29 }
   0xd   :  { %p605_p6 = por %p604_p5, %p603_p4 }
   0xf   :  { %p606_p7 = pnand %p605_p6, %p599_p3 }
  0x11   :  { %609 = shalt.err (!%p606_p7)
}
  0x12   :  { %s684_s30 = smov 128   ;;  %s685_s6 = smov 8  }
  0x13   :  { %36 = dma.hbm_to_vmem [thread:$0]  %s804_s1, 2048, %s31_s19, [#allocation6], %s684_s30, %s684_s30, %s685_s6  }
  0x14   :  { %s610_s11 = scalar_lea.hbm %s803_s0, 512 }
  0x15   :  { %p611_p8 = scmp.ne.s32.totalorder %s803_s0, %s610_s11  ;;  %p614_p9 = scmp.lt.u32.totalorder %s610_s11, %s803_s0 }
  0x17   :  { %p616_p10 = pnand %p614_p9, %p611_p8 }
  0x19   :  { %619 = shalt.err (!%p616_p10)
}
  0x1a   :  { %s620_s16 = scalar_lea.vmem %s718_s21, 512  ;;  %p625_p12 = scmp.lt.s32.totalorder %s718_s21, %s718_s21 }
  0x1b   :  { %p621_p11 = scmp.ne.s32.totalorder %s718_s21, %s620_s16  ;;  %p626_p13 = scmp.lt.s32.totalorder %s620_s16, %s620_s16 }
  0x1d   :  { %p627_p0 = por %p626_p13, %p625_p12 }
  0x1f   :  { %p628_p1 = pnand %p627_p0, %p621_p11 }
  0x21   :  { %631 = shalt.err (!%p628_p1)
}
  0x22   :  { %24 = dma.hbm_to_vmem [thread:$0]  %s803_s0, 512, %s718_s21, [#allocation3], %s684_s30, %s684_s30, %s685_s6  }
  0x23   :  { %s686_s18 = smov [#allocation7]   ;;  %s632_s23 = scalar_lea.hbm %s806_s3, 2048 }
  0x24   :  { %s44_s19 = sshll.u32 %s686_s18, 4  ;;  %p633_p2 = scmp.ne.s32.totalorder %s806_s3, %s632_s23  ;;  %s45_s19 = int_to_ptr.vmem [resolvable:$true] %s44_s19 }
  0x25   :  { %p636_p3 = scmp.lt.u32.totalorder %s632_s23, %s806_s3 }
  0x27   :  { %p638_p4 = pnand %p636_p3, %p633_p2 }
  0x29   :  { %641 = shalt.err (!%p638_p4)
}
  0x2a   :  { %s642_s28 = scalar_lea.vmem %s45_s19, 2048  ;;  %p647_p6 = scmp.lt.s32.totalorder %s45_s19, %s45_s19 }
  0x2b   :  { %p643_p5 = scmp.ne.s32.totalorder %s45_s19, %s642_s28  ;;  %p648_p7 = scmp.lt.s32.totalorder %s642_s28, %s642_s28 }
  0x2d   :  { %p649_p8 = por %p648_p7, %p647_p6 }
  0x2f   :  { %p650_p9 = pnand %p649_p8, %p643_p5 }
  0x31   :  { %653 = shalt.err (!%p650_p9)
}
  0x32   :  { %50 = dma.hbm_to_vmem [thread:$0]  %s806_s3, 2048, %s45_s19, [#allocation6], %s684_s30, %s684_s30, %s685_s6  }
  0x33   :  { %676 = dma.done.wait [#allocation3], 512  }
  0x34   :  { %677 = vsyncadd [#allocation3], 4294966784 }
  0x35   :  { %678 = dma.done.wait [#allocation6], 4096  }
  0x36   :  { %679 = vsyncadd [#allocation6], 4294963200  ;;  %v66_v0 = vld [vmem:[#allocation5] sm:$0xff]  ;;  %v67_v1 = vld [vmem:[#allocation5 + $0x8] sm:$0xff]  ;;  %s687_s8 = smov [#allocation8]  }
  0x37   :  { %v68_v2 = vld [vmem:[#allocation5 + $0x10] sm:$0xff]  ;;  %v502_v3 = vpack.c.bf16 %v67_v1, %v66_v0  ;;  %v69_v4 = vld [vmem:[#allocation5 + $0x18] sm:$0xff]  ;;  %v70_v6 = vld [vmem:[#allocation5 + $0x20] sm:$0xff]  ;;  %s371_s9 = sshll.u32 %s687_s8, 4  ;;  %s372_s9 = int_to_ptr.vmem [resolvable:$true] %s371_s9 }
  0x38   :  { %v506_v5 = vpack.c.bf16 %v69_v4, %v68_v2  ;;  %v71_v7 = vld [vmem:[#allocation5 + $0x28] sm:$0xff]  ;;  %v62_v9 = vld [vmem:[#allocation2] sm:$0xff]  ;;  %v72_v10 = vld [vmem:[#allocation5 + $0x30] sm:$0xff]  ;;  %s654_s10 = scalar_lea.vmem %s372_s9, 512  ;;  %p659_p11 = scmp.lt.s32.totalorder %s372_s9, %s372_s9 }
  0x39   :  { %503 = vmatprep.subr.bf16.mxu0 %v502_v3  ;;  %v510_v8 = vpack.c.bf16 %v71_v7, %v70_v6  ;;  %v73_v11 = vld [vmem:[#allocation5 + $0x38] sm:$0xff]  ;;  %458 = vmatprep.mubr.f32.mxu0 %v62_v9  ;;  %v74_v13 = vld [vmem:[#allocation5 + $0x40] sm:$0xff]  ;;  %v75_v14 = vld [vmem:[#allocation5 + $0x48] sm:$0xff]  ;;  %p655_p10 = scmp.ne.s32.totalorder %s372_s9, %s654_s10  ;;  %p660_p12 = scmp.lt.s32.totalorder %s654_s10, %s654_s10 }
  0x3a   :  { %505 = vmatpush3.bf16.msra.mxu0 %v502_v3  ;;  %v514_v12 = vpack.c.bf16 %v73_v11, %v72_v10  ;;  %v518_v15 = vpack.c.bf16 %v75_v14, %v74_v13  ;;  %v76_v16 = vld [vmem:[#allocation5 + $0x50] sm:$0xff]  ;;  %v77_v17 = vld [vmem:[#allocation5 + $0x58] sm:$0xff]  ;;  %v78_v19 = vld [vmem:[#allocation5 + $0x60] sm:$0xff] }
  0x3b   :  { %507 = vmatprep.subr.bf16.mxu0 %v506_v5  ;;  %v522_v18 = vpack.c.bf16 %v77_v17, %v76_v16  ;;  %v79_v20 = vld [vmem:[#allocation5 + $0x68] sm:$0xff]  ;;  %v80_v22 = vld [vmem:[#allocation5 + $0x70] sm:$0xff]  ;;  %v81_v23 = vld [vmem:[#allocation5 + $0x78] sm:$0xff]  ;;  %p661_p13 = por %p660_p12, %p659_p11 }
  0x3c   :  { %v526_v21 = vpack.c.bf16 %v79_v20, %v78_v19  ;;  %v530_v24 = vpack.c.bf16 %v81_v23, %v80_v22  ;;  %v63_v25 = vld [vmem:[#allocation2 + $0x8] sm:$0xff]  ;;  %v64_v26 = vld [vmem:[#allocation2 + $0x10] sm:$0xff]  ;;  %v65_v27 = vld [vmem:[#allocation2 + $0x18] sm:$0xff] }
  0x3d   :  { %v230_v28 = vld [vmem:[#allocation7] sm:$0xff]  ;;  %v231_v29 = vld [vmem:[#allocation7 + $0x8] sm:$0xff]  ;;  %v232_v31 = vld [vmem:[#allocation7 + $0x10] sm:$0xff]  ;;  %p662_p0 = pnand %p661_p13, %p655_p10 }
  0x3e   :  { %509 = vmatpush3.bf16.msra.mxu0 %v506_v5  ;;  %v534_v30 = vpack.c.bf16 %v231_v29, %v230_v28  ;;  %v233_v32 = vld [vmem:[#allocation7 + $0x18] sm:$0xff]  ;;  %v234_v34 = vld [vmem:[#allocation7 + $0x20] sm:$0xff]  ;;  %v235_v35 = vld [vmem:[#allocation7 + $0x28] sm:$0xff] }
  0x3f   :  { %511 = vmatprep.subr.bf16.mxu0 %v510_v8  ;;  %v538_v33 = vpack.c.bf16 %v233_v32, %v232_v31  ;;  %v542_v36 = vpack.c.bf16 %v235_v35, %v234_v34  ;;  %v236_v37 = vld [vmem:[#allocation7 + $0x30] sm:$0xff]  ;;  %v237_v38 = vld [vmem:[#allocation7 + $0x38] sm:$0xff]  ;;  %v238_v40 = vld [vmem:[#allocation7 + $0x40] sm:$0xff] }
  0x40   :  { %535 = vmatprep.subr.bf16.mxu1 %v534_v30  ;;  %v546_v39 = vpack.c.bf16 %v237_v38, %v236_v37  ;;  %v239_v41 = vld [vmem:[#allocation7 + $0x48] sm:$0xff]  ;;  %v240_v43 = vld [vmem:[#allocation7 + $0x50] sm:$0xff]  ;;  %v241_v44 = vld [vmem:[#allocation7 + $0x58] sm:$0xff] }
  0x41   :  { %537 = vmatpush3.bf16.msra.mxu1 %v534_v30  ;;  %v550_v42 = vpack.c.bf16 %v239_v41, %v238_v40  ;;  %v554_v45 = vpack.c.bf16 %v241_v44, %v240_v43  ;;  %v242_v46 = vld [vmem:[#allocation7 + $0x60] sm:$0xff]  ;;  %v243_v47 = vld [vmem:[#allocation7 + $0x68] sm:$0xff]  ;;  %v244_v49 = vld [vmem:[#allocation7 + $0x70] sm:$0xff] }
  0x42   :  { %513 = vmatpush3.bf16.msra.mxu0 %v510_v8  ;;  %539 = vmatprep.subr.bf16.mxu1 %v538_v33  ;;  %v558_v48 = vpack.c.bf16 %v243_v47, %v242_v46  ;;  %v245_v50 = vld [vmem:[#allocation7 + $0x78] sm:$0xff]  ;;  %v384_v52 = vld [vmem:[%s805_s2] ss:$0 sm:$0xff] }
  0x43   :  { %515 = vmatprep.subr.bf16.mxu0 %v514_v12  ;;  %v562_v51 = vpack.c.bf16 %v245_v50, %v244_v49  ;;  %v385_v49 = vld [vmem:[%s807_s4] ss:$0 sm:$0xff] }
  0x45   :  { %541 = vmatpush3.bf16.msra.mxu1 %v538_v33 }
  0x46   :  { %517 = vmatpush3.bf16.msra.mxu0 %v514_v12  ;;  %543 = vmatprep.subr.bf16.mxu1 %v542_v36 }
  0x47   :  { %519 = vmatprep.subr.bf16.mxu0 %v518_v15 }
  0x49   :  { %545 = vmatpush3.bf16.msra.mxu1 %v542_v36 }
  0x4a   :  { %521 = vmatpush3.bf16.msra.mxu0 %v518_v15  ;;  %547 = vmatprep.subr.bf16.mxu1 %v546_v39 }
  0x4b   :  { %523 = vmatprep.subr.bf16.mxu0 %v522_v18 }
  0x4d   :  { %549 = vmatpush3.bf16.msra.mxu1 %v546_v39 }
  0x4e   :  { %525 = vmatpush3.bf16.msra.mxu0 %v522_v18  ;;  %551 = vmatprep.subr.bf16.mxu1 %v550_v42 }
  0x4f   :  { %527 = vmatprep.subr.bf16.mxu0 %v526_v21 }
  0x51   :  { %553 = vmatpush3.bf16.msra.mxu1 %v550_v42 }
  0x52   :  { %529 = vmatpush3.bf16.msra.mxu0 %v526_v21  ;;  %555 = vmatprep.subr.bf16.mxu1 %v554_v45 }
  0x53   :  { %531 = vmatprep.subr.bf16.mxu0 %v530_v24 }
  0x55   :  { %557 = vmatpush3.bf16.msra.mxu1 %v554_v45 }
  0x56   :  { %533 = vmatpush3.bf16.msra.mxu0 %v530_v24  ;;  %559 = vmatprep.subr.bf16.mxu1 %v558_v48 }
  0x59   :  { %459 = vmatmul.mubr.f32.vlgmr.msra.gmra.mrb[0].mxu0 %v63_v25  ;;  %561 = vmatpush3.bf16.msra.mxu1 %v558_v48 }
  0x5a   :  { %461 = vmatprep.mubr.f32.mxu0 %v64_v26  ;;  %563 = vmatprep.subr.bf16.mxu1 %v562_v51 }
  0x5d   :  { %462 = vmatmul.mubr.f32.gmra.mrb[2].mxu0 %v65_v27  ;;  %565 = vmatpush3.bf16.msra.mxu1 %v562_v51 }
 0x12c   :  { %v460_v53 = vpop.f32.mrb[0].mxu0 }
 0x12d   :  { %v773_v54 = vadd.f32 %v460_v53, %v384_v52  ;;  %v155_v55 = vpop.f32.mrb[1].mxu0 }
 0x12e   :  { %v156_v56 = vadd.f32 %v384_v52, %v155_v55 }
 0x12f   :  { %v175_v57 = vmin.f32 %v773_v54, 20.0  ;;  %vm215_vm1 = vcmp.gt.f32.partialorder %v773_v54, 20.0 }
 0x130   :  { %v174_v58 = vmin.f32 %v156_v56, 20.0  ;;  %v463_v59 = vpop.f32.mrb[2].mxu0  ;;  %vm214_vm0 = vcmp.gt.f32.partialorder %v156_v56, 20.0 }
 0x131   :  { %v180_v60 = vmul.f32 1.442695, %v175_v57  ;;  %v776_v61 = vadd.f32 %v463_v59, %v384_v52  ;;  %v165_v62 = vpop.f32.mrb[3].mxu0 }
 0x132   :  { %v178_v63 = vmul.f32 1.442695, %v174_v58  ;;  %v166_v0 = vadd.f32 %v384_v52, %v165_v62 }
 0x133   :  { %572 = vpow2.f32 %v180_v60  ;;  %v177_v1 = vmin.f32 %v776_v61, 20.0  ;;  %vm217_vm3 = vcmp.gt.f32.partialorder %v776_v61, 20.0 }
 0x134   :  { %574 = vpow2.f32 %v178_v63  ;;  %v176_v2 = vmin.f32 %v166_v0, 20.0  ;;  %vm216_vm2 = vcmp.gt.f32.partialorder %v166_v0, 20.0 }
 0x135   :  { %v184_v3 = vmul.f32 1.442695, %v177_v1 }
 0x136   :  { %v182_v4 = vmul.f32 1.442695, %v176_v2 }
 0x137   :  { %576 = vpow2.f32 %v184_v3 }
 0x138   :  { %578 = vpow2.f32 %v182_v4 }
 0x13d   :  { %v573_v5 = vpop.eup %572 }
 0x13e   :  { %v575_v6 = vpop.eup %574  ;;  %v187_v7 = vadd.f32 2.0, %v573_v5 }
 0x13f   :  { %v186_v8 = vadd.f32 2.0, %v575_v6 }
 0x140   :  { %v191_v9 = vmul.f32 %v573_v5, %v187_v7 }
 0x141   :  { %v577_v10 = vpop.eup %576  ;;  %v190_v11 = vmul.f32 %v575_v6, %v186_v8 }
 0x142   :  { %v579_v12 = vpop.eup %578  ;;  %v195_v13 = vadd.f32 2.0, %v191_v9  ;;  %v189_v14 = vadd.f32 2.0, %v577_v10  ;;  %v219_v30 = vmul.f32 %v191_v9, %v773_v54 }
 0x143   :  { %v194_v15 = vadd.f32 2.0, %v190_v11  ;;  %v188_v16 = vadd.f32 2.0, %v579_v12  ;;  %v218_v33 = vmul.f32 %v190_v11, %v156_v56 }
 0x144   :  { %580 = vrcp.f32 %v195_v13  ;;  %v193_v17 = vmul.f32 %v577_v10, %v189_v14 }
 0x145   :  { %582 = vrcp.f32 %v194_v15  ;;  %v192_v18 = vmul.f32 %v579_v12, %v188_v16 }
 0x146   :  { %v197_v19 = vadd.f32 2.0, %v193_v17  ;;  %v221_v40 = vmul.f32 %v193_v17, %v776_v61 }
 0x147   :  { %v196_v20 = vadd.f32 2.0, %v192_v18  ;;  %v220_v43 = vmul.f32 %v192_v18, %v166_v0 }
 0x148   :  { %584 = vrcp.f32 %v197_v19 }
 0x149   :  { %586 = vrcp.f32 %v196_v20 }
 0x14e   :  { %v581_v21 = vpop.eup %580 }
 0x14f   :  { %v583_v22 = vpop.eup %582  ;;  %v203_v23 = vmul.f32 %v581_v21, %v195_v13 }
 0x150   :  { %v202_v24 = vmul.f32 %v583_v22, %v194_v15 }
 0x151   :  { %v207_v25 = vsub.f32 2.0, %v203_v23 }
 0x152   :  { %v585_v26 = vpop.eup %584  ;;  %v206_v27 = vsub.f32 2.0, %v202_v24 }
 0x153   :  { %v587_v28 = vpop.eup %586  ;;  %v211_v29 = vmul.f32 %v581_v21, %v207_v25  ;;  %v205_v31 = vmul.f32 %v585_v26, %v197_v19 }
 0x154   :  { %v210_v32 = vmul.f32 %v583_v22, %v206_v27  ;;  %v204_v34 = vmul.f32 %v587_v28, %v196_v20 }
 0x155   :  { %v223_v35 = vmul.f32 %v219_v30, %v211_v29  ;;  %v209_v36 = vsub.f32 2.0, %v205_v31 }
 0x156   :  { %v222_v37 = vmul.f32 %v218_v33, %v210_v32  ;;  %v208_v38 = vsub.f32 2.0, %v204_v34 }
 0x157   :  { %v213_v39 = vmul.f32 %v585_v26, %v209_v36  ;;  %v227_v44 = vsel %vm215_vm1, %v773_v54, %v223_v35 }
 0x158   :  { %v226_v41 = vsel %vm214_vm0, %v156_v56, %v222_v37  ;;  %v212_v42 = vmul.f32 %v587_v28, %v208_v38 }
 0x159   :  { %496 = vmatprep.mubr.f32.mxu1 %v226_v41  ;;  %v225_v45 = vmul.f32 %v221_v40, %v213_v39 }
 0x15a   :  { %497 = vmatmul.mubr.f32.vlgmr.msra.gmra.mrb[0].mxu1 %v227_v44  ;;  %v224_v46 = vmul.f32 %v220_v43, %v212_v42 }
 0x15b   :  { %v229_v48 = vsel %vm217_vm3, %v776_v61, %v225_v45 }
 0x15c   :  { %v228_v47 = vsel %vm216_vm2, %v166_v0, %v224_v46 }
 0x15d   :  { %499 = vmatprep.mubr.f32.mxu1 %v228_v47 }
 0x15e   :  { %500 = vmatmul.mubr.f32.gmra.mrb[2].mxu1 %v229_v48 }
 0x22d   :  { %v498_v50 = vpop.f32.mrb[0].mxu1 }
 0x22e   :  { %v343_v51 = vadd.f32 %v498_v50, %v385_v49  ;;  %v312_v52 = vpop.f32.mrb[1].mxu1 }
 0x22f   :  { %v342_v53 = vadd.f32 %v385_v49, %v312_v52 }
 0x230   :  { %347 = vst [vmem:[#allocation8 + $0x8] sm:$0xff] %v343_v51 }
 0x231   :  { %346 = vst [vmem:[#allocation8] sm:$0xff] %v342_v53  ;;  %v501_v54 = vpop.f32.mrb[2].mxu1 }
 0x232   :  { %v345_v55 = vadd.f32 %v501_v54, %v385_v49  ;;  %v322_v56 = vpop.f32.mrb[3].mxu1 }
 0x233   :  { %v344_v57 = vadd.f32 %v385_v49, %v322_v56 }
 0x234   :  { %349 = vst [vmem:[#allocation8 + $0x18] sm:$0xff] %v345_v55 }
 0x235   :  { %348 = vst [vmem:[#allocation8 + $0x10] sm:$0xff] %v344_v57 }
 0x236   :  { %665 = shalt.err (!%p662_p0)
}
 0x237   :  { %s666_s12 = scalar_lea.hbm %s808_s5, 512 }
 0x238   :  { %p667_p1 = scmp.ne.s32.totalorder %s808_s5, %s666_s12  ;;  %p670_p2 = scmp.lt.u32.totalorder %s666_s12, %s808_s5 }
 0x23a   :  { %p672_p3 = pnand %p670_p2, %p667_p1 }
 0x23c   :  { %675 = shalt.err (!%p672_p3)
}
 0x23d   :  { %377 = dma.vmem_to_hbm [thread:$0]  %s372_s9, 512, %s808_s5, [#allocation4], %s684_s30, %s684_s30, %s685_s6  }
 0x23e   :  { %680 = dma.done.wait [#allocation4], 512  }
 0x23f   :  { %681 = vsyncadd [#allocation4], 4294966784 }
 0x240   :  { %381 = vsyncpa [#allocation3], 1 }
 0x241   :  { %382 = vsyncpa [#allocation6], 1 }
 0x242   :  { %383 = vsyncpa [#allocation4], 1 }

</bundles_post_ra>
